<compile_context>
chip_gen: v5e
topology: v5e:2x2
jax: 0.10.0
libtpu: 0.0.40
codegen_flags: <defaults>
</compile_context>

<pallas_src>
import math
import numpy as np
import jax
import jax.numpy as jnp
from jax.experimental import pallas as pl
from jax.experimental.pallas import tpu as pltpu

# ----------------------------- configuration -------------------------------
B = 2
IN_PLANES = 8
OUT_PLANES = 8
H = 16
W = 16
K_H = 3
K_W = 3
STRIDE = 1
PADDING = 1
DILATION = 1
GROUPS = 1
BIAS = False                      # KWconvNd default

# warehouse cell shape: (num_cells, cell_out, cell_in, k_h, k_w)
NUM_SPATIAL_CELLS = 4
CELL_OUT = 4
CELL_IN = 4

NUM_FOURIER_BASIS = 1
NUM_FREQ_MIXTURES = 16
REDUCTION = 0.25
BN_EPS = 1e-5
TEMP_VALUE = 0.0                  # self.temp_value default (update_temperature not called)

HIDDEN = max(int(IN_PLANES * REDUCTION), 16)
GOC = OUT_PLANES // CELL_OUT                       # groups_out_channel
GIC = IN_PLANES // CELL_IN // GROUPS               # groups_in_channel
GS = (K_H // K_H) * (K_W // K_W)                   # groups_spatial
NLM = GOC * GIC * GS                               # num_local_mixture
KPM = NUM_SPATIAL_CELLS + 1                        # kw_planes_per_mixture
KW_PLANES = KPM * NLM
KWF = IN_PLANES * NUM_FREQ_MIXTURES * (NUM_FOURIER_BASIS + 1)   # kw_planes_fourier
CELL_NUMEL = CELL_OUT * CELL_IN * K_H * K_W
AGG = NLM * CELL_NUMEL                             # 576
AGG_PAD = ((AGG + 127) // 128) * 128               # 640 -> lane-dense agg output

H_OUT = (H + 2 * PADDING - DILATION * (K_H - 1) - 1) // STRIDE + 1
W_OUT = (W + 2 * PADDING - DILATION * (K_W - 1) - 1) // STRIDE + 1
P = H_OUT * W_OUT                                  # 256 output pixels (lane-dense)
K_IM2COL = (IN_PLANES // GROUPS) * K_H * K_W       # 72
K_TOTAL = K_IM2COL + IN_PLANES // GROUPS + 1       # 81 : conv | mixer*bn_scale | bn_shift

# Concrete KWConv2d permute (base class leaves it None):
# aggregate weight dims are [B, gs, goc, gic, cell_out, cell_in, kh, kw]
PERMUTE = (0, 2, 4, 3, 5, 1, 6, 7)

assert STRIDE == 1 and GROUPS == 1  # TODO(synk): generalize to stride>1 / groups>1


def _tensorcores_per_chip():
    # v7x exposes 2 TensorCores per chip; single-TC generations keep the grid-less form.
    try:
        kind = jax.devices()[0].device_kind.lower()
    except Exception:
        return 1
    return 2 if "v7" in kind else 1


NUM_TC = _tensorcores_per_chip()

_VMEM_SPEC = pl.BlockSpec(memory_space=pltpu.MemorySpace.VMEM)

_K1_COST = pl.CostEstimate(
    flops=2 * B * (IN_PLANES * HIDDEN + HIDDEN * KWF + HIDDEN * KW_PLANES
                   + 2 * KW_PLANES * NLM + KW_PLANES * AGG_PAD),
    transcendentals=B * NLM,
    bytes_accessed=(B * IN_PLANES * H * W * 4 + IN_PLANES * HIDDEN * 2
                    + 2 * HIDDEN * 4 + HIDDEN * KW_PLANES * 2 + KW_PLANES * 4
                    + HIDDEN * KWF * 2 + KWF * 4 + 2 * KW_PLANES * NLM * 4
                    + KW_PLANES * AGG_PAD * 2 + B * AGG_PAD * 4 + B * KWF * 4),
)

_K2_COST = pl.CostEstimate(
    flops=2 * B * OUT_PLANES * K_TOTAL * P,
    transcendentals=0,
    bytes_accessed=(B * OUT_PLANES * K_TOTAL * 2 + B * K_TOTAL * P * 2
                    + B * OUT_PLANES * P * 4),
)


# ------------------------------ Pallas kernels ------------------------------
def attention_aggregate_kernel(x_ref, w1_ref, s1_ref, b1_ref,
                               wsp_ref, bsp_ref, wf_ref, bf_ref,
                               g_ref, gt_ref, cells_big_ref,
                               agg_ref, attf_ref):
    # x_ref : (B, C_in, H*W) f32
    # outputs: agg (B, AGG_PAD) f32 (lane-dense, pad sliced off in wrapper),
    #          attf (B, KWF) f32 (lane-dense).
    pooled = jnp.mean(x_ref[...], axis=-1)                                   # AdaptiveAvgPool1d(1)
    h = jnp.dot(pooled.astype(jnp.bfloat16), w1_ref[...],
                preferred_element_type=jnp.float32)                          # fc1 (no bias)
    h = jnp.maximum(h * s1_ref[...] + b1_ref[...], 0.0)                      # BN1d(eval) + ReLU
    h16 = h.astype(jnp.bfloat16)
    attf_ref[...] = jnp.dot(h16, wf_ref[...],
                            preferred_element_type=jnp.float32) + bf_ref[...]  # fourier head
    att = jnp.dot(h16, wsp_ref[...],
                  preferred_element_type=jnp.float32) + bsp_ref[...]         # spatial head (B, KW_PLANES)

    # Per-mixture L1 normalization with precomputed 0/1 group matrices (no in-kernel iota).
    denom = jnp.dot(jnp.abs(att), g_ref[...],
                    preferred_element_type=jnp.float32) + 0.001              # (B, NLM)
    inv = pl.reciprocal(denom, approx=True)                                  # EUP slot
    att = att * jnp.dot(inv, gt_ref[...], preferred_element_type=jnp.float32)

    # TODO(synk): temperature mixing elided — module default temp_value == 0 (identity mix).

    # Aggregation with block-diagonal cells matrix (zero-cell rows are zero -> the
    # PyTorch "[:, :-1]" drop is implicit).  Output is per-mixture-flattened + lane-padded.
    agg_ref[...] = jnp.dot(att.astype(jnp.bfloat16), cells_big_ref[...],
                           preferred_element_type=jnp.float32)


def conv_bn_kernel_batched(lhs_ref, rhs_ref, o_ref):
    # Grid-less form (single-TC chips).  lhs (B, C_out, K_TOTAL) bf16,
    # rhs (B, K_TOTAL, P) bf16, o (B, C_out, P) f32.  One fused matmul per sample:
    # conv + BN-folded pointwise mixer + shift (bias row of ones).
    for b in range(lhs_ref.shape[0]):       # static unroll; B is tiny
        o_ref[b] = jnp.dot(lhs_ref[b], rhs_ref[b], preferred_element_type=jnp.float32)


def conv_bn_kernel_grid(lhs_ref, rhs_ref, o_ref):
    # Batch-parallel grid form (2-TC chips): one sample per grid step / core.
    o_ref[...] = jnp.dot(lhs_ref[...], rhs_ref[...], preferred_element_type=jnp.float32)


# ------------------------------- parameters --------------------------------
def init_params(key):
    ks = jax.random.split(key, 6)
    p = {}
    # Attention MLP weights (stored bf16: MXU operands).
    p['fc1_w'] = (jax.random.normal(ks[0], (IN_PLANES, HIDDEN), jnp.float32) * 0.1
                  ).astype(jnp.bfloat16)
    # BatchNorm1d eval-mode: running_mean=0, running_var=1, gamma=1, beta=0
    p['bn1_scale'] = jnp.full((1, HIDDEN), 1.0 / math.sqrt(1.0 + BN_EPS), jnp.float32)
    p['bn1_shift'] = jnp.zeros((1, HIDDEN), jnp.float32)
    p['spatial_w'] = (jax.random.normal(ks[1], (HIDDEN, KW_PLANES), jnp.float32) * 0.1
                      ).astype(jnp.bfloat16)
    p['spatial_b'] = jnp.zeros((1, KW_PLANES), jnp.float32)
    p['fourier_w'] = (jax.random.normal(ks[2], (HIDDEN, KWF), jnp.float32) * 0.1
                      ).astype(jnp.bfloat16)
    p['fourier_b'] = jnp.zeros((1, KWF), jnp.float32)

    # warehouse cells (warehouse_manager.take_cell) — synthetic, deterministic
    cells = jax.random.normal(
        ks[3], (NUM_SPATIAL_CELLS, CELL_OUT, CELL_IN, K_H, K_W), jnp.float32) * 0.1
    p['cells'] = cells
    # Hoisted block-diagonal cells matrix: row m*KPM+n -> cell n placed at mixture-m block.
    cells_flat = cells.reshape(NUM_SPATIAL_CELLS, CELL_NUMEL)
    cells_pad = jnp.concatenate(
        [cells_flat, jnp.zeros((1, CELL_NUMEL), jnp.float32)], axis=0)       # append zero cell
    cells_big = jnp.einsum('ij,nd->injd', jnp.eye(NLM, dtype=jnp.float32), cells_pad)
    cells_big = cells_big.reshape(KW_PLANES, AGG)
    cells_big = jnp.pad(cells_big, ((0, 0), (0, AGG_PAD - AGG)))             # lane pad 576 -> 640
    p['cells_big'] = cells_big.astype(jnp.bfloat16)

    # Precomputed per-mixture group-sum matrices (replaces in-kernel iota/compare).
    g_np = (np.arange(KW_PLANES)[:, None] // KPM
            == np.arange(NLM)[None, :]).astype(np.float32)                   # (KW_PLANES, NLM)
    p['norm_G'] = jnp.asarray(g_np)
    p['norm_Gt'] = jnp.asarray(g_np.T)                                       # (NLM, KW_PLANES)

    # synthetic real-valued Fourier basis: (num_fourier_basis+1, H, W//2+1)
    # TODO(synk): warehouse manager / basis class not provided; real basis assumed, so the
    #             spectral multiply stays a real*complex elementwise product.
    p['fourier_basis'] = jax.random.normal(
        ks[4], (NUM_FOURIER_BASIS + 1, H, W // 2 + 1), jnp.float32) * 0.1

    # pointwise mixer weight (Conv2d 1x1, layout (out, in)) with BatchNorm2d(eval) folded in.
    mixer_w = jax.random.normal(
        ks[5], (OUT_PLANES, IN_PLANES // GROUPS), jnp.float32) * 0.1
    bn2_scale = jnp.full((OUT_PLANES, 1), 1.0 / math.sqrt(1.0 + BN_EPS), jnp.float32)
    bn2_shift = jnp.zeros((OUT_PLANES, 1), jnp.float32)
    p['mixer_w'] = mixer_w
    p['mw_scaled'] = (mixer_w * bn2_scale).astype(jnp.bfloat16)              # (C_out, C_in)
    p['bn2_shift16'] = bn2_shift.astype(jnp.bfloat16)                        # (C_out, 1)
    return p


# --------------------------------- forward ---------------------------------
@jax.jit
def kwconv2d_forward(params, x):
    B_, C_in, H_, W_ = x.shape
    HW = H_ * W_

    # ---- fused attention MLP + L1-norm + cell aggregation (Pallas kernel 1) ----
    x_flat = x.reshape(B_, C_in, HW)
    agg_pad, att_f = pl.pallas_call(
        attention_aggregate_kernel,
        out_shape=(jax.ShapeDtypeStruct((B_, AGG_PAD), jnp.float32),
                   jax.ShapeDtypeStruct((B_, KWF), jnp.float32)),
        in_specs=[_VMEM_SPEC] * 11,
        out_specs=(_VMEM_SPEC, _VMEM_SPEC),
        cost_estimate=_K1_COST,
    )(x_flat, params['fc1_w'], params['bn1_scale'], params['bn1_shift'],
      params['spatial_w'], params['spatial_b'],
      params['fourier_w'], params['fourier_b'],
      params['norm_G'], params['norm_Gt'], params['cells_big'])
    agg_flat = agg_pad[:, :AGG]                         # drop lane padding

    # ---- assemble per-sample conv weights (static, tiny reshape/permute glue) ----
    aw = agg_flat.reshape(B_, GS, GOC, GIC, CELL_OUT, CELL_IN, K_H, K_W)
    aw = jnp.transpose(aw, PERMUTE)                     # (B, GOC, CO, GIC, CI, GS, KH, KW)
    # flatten to (B, C_out, C_in*KH*KW) — contraction order (c_in, kh, kw) matches im2col
    aw = aw.reshape(B_, OUT_PLANES, K_IM2COL).astype(jnp.bfloat16)

    # ---- im2col in the wrapper (XLA): (B, C_in*KH*KW, H_out*W_out) ----
    x_padded = jnp.pad(x, ((0, 0), (0, 0), (PADDING, PADDING), (PADDING, PADDING)))
    taps = [x_padded[:, :, i * DILATION:i * DILATION + H_OUT, j * DILATION:j * DILATION + W_OUT]
            for i in range(K_H) for j in range(K_W)]
    patches = jnp.stack(taps, axis=2)                   # (B, C_in, KH*KW, H_out, W_out)
    patches = patches.reshape(B_, K_IM2COL, P).astype(jnp.bfloat16)

    # --------------------------- Fourier path (plain JAX) ---------------------------
    # TODO(synk): rfft2 / irfft2 have no Pallas equivalent; they stay in XLA, and the tiny
    #             spectral elementwise multiply fuses into the same XLA graph.
    x_ft = jnp.fft.rfft2(x, s=(H_, W_), norm='ortho')          # complex64 (B, C, H, W//2+1)
    w_f = W_ // 2 + 1
    coeff = jax.nn.softmax(
        att_f.reshape(B_, C_in, NUM_FREQ_MIXTURES, NUM_FOURIER_BASIS + 1), axis=-1)
    mix_h = int(np.sqrt(NUM_FREQ_MIXTURES))
    mix_w = int(np.sqrt(NUM_FREQ_MIXTURES))
    h_crop = H_ // mix_h * mix_h
    wf_crop = w_f // mix_w * mix_w
    ph = h_crop // mix_h
    pwf = wf_crop // mix_w
    basis = params['fourier_basis'][:, :h_crop, :wf_crop]
    basis_p = basis.reshape(NUM_FOURIER_BASIS + 1, mix_h, ph, mix_w, pwf)
    basis_p = jnp.transpose(basis_p, (1, 3, 0, 2, 4)).reshape(
        NUM_FREQ_MIXTURES, NUM_FOURIER_BASIS + 1, ph, pwf)
    kern_p = jnp.einsum('bimk,mkhw->bimhw', coeff, basis_p)    # (B, C, M, ph, pwf) real
    kern_full = kern_p.reshape(B_, C_in, mix_h, mix_w, ph, pwf)
    kern_full = jnp.transpose(kern_full, (0, 1, 2, 4, 3, 5)).reshape(B_, C_in, h_crop, wf_crop)
    out_crop = x_ft[:, :, :h_crop, :wf_crop] * kern_full       # complex * real, elementwise
    out_ft = jnp.zeros_like(x_ft).at[:, :, :h_crop, :wf_crop].set(out_crop)
    # stride == 1 -> target_s = (H, W)
    out_fourier_dw = jnp.fft.irfft2(out_ft, s=(H_, W_), norm='ortho')   # (B, C, H, W) f32
    xf = out_fourier_dw.reshape(B_, C_in, HW).astype(jnp.bfloat16)      # channels-first

    # ---- fused per-sample conv + BN-folded 1x1 mixer + shift (Pallas kernel 2) ----
    # output = conv(aw, patches) + BN2(mixer(xf))
    #        = [aw | scale*mw | shift] @ [patches ; xf ; ones]
    lhs = jnp.concatenate(
        [aw,
         jnp.broadcast_to(params['mw_scaled'][None], (B_, OUT_PLANES, IN_PLANES // GROUPS)),
         jnp.broadcast_to(params['bn2_shift16'][None], (B_, OUT_PLANES, 1))],
        axis=2)                                                         # (B, C_out, 81) bf16
    rhs = jnp.concatenate(
        [patches, xf, jnp.ones((B_, 1, HW), jnp.bfloat16)], axis=1)     # (B, 81, 256) bf16

    if NUM_TC >= 2:
        # v7x: batch-parallel grid so both TensorCores are used (one sample each).
        out_rows = pl.pallas_call(
            conv_bn_kernel_grid,
            out_shape=jax.ShapeDtypeStruct((B_, OUT_PLANES, P), jnp.float32),
            grid=(B_,),
            in_specs=[pl.BlockSpec((None, OUT_PLANES, K_TOTAL), lambda b: (b, 0, 0)),
                      pl.BlockSpec((None, K_TOTAL, P), lambda b: (b, 0, 0))],
            out_specs=pl.BlockSpec((None, OUT_PLANES, P), lambda b: (b, 0, 0)),
            compiler_params=pltpu.CompilerParams(dimension_semantics=("parallel",)),
            cost_estimate=_K2_COST,
        )(lhs, rhs)
    else:
        # v5e / v6e: single TensorCore -> grid-less (no per-step overhead).
        out_rows = pl.pallas_call(
            conv_bn_kernel_batched,
            out_shape=jax.ShapeDtypeStruct((B_, OUT_PLANES, P), jnp.float32),
            in_specs=[_VMEM_SPEC, _VMEM_SPEC],
            out_specs=_VMEM_SPEC,
            cost_estimate=_K2_COST,
        )(lhs, rhs)

    out = out_rows.reshape(B_, OUT_PLANES, H_OUT, W_OUT)       # already NCHW — no transpose
    # self.bias is None (bias=False) -> nothing to add
    return out


# ----------------------------------- main -----------------------------------
if __name__ == "__main__":
    key = jax.random.PRNGKey(0)
    pkey, xkey = jax.random.split(key)
    params = init_params(pkey)
    x = jax.random.normal(xkey, (B, IN_PLANES, H, W), jnp.float32)

    out = kwconv2d_forward(params, x)
    out = jax.block_until_ready(out)

    assert out.shape == (B, OUT_PLANES, H_OUT, W_OUT), out.shape
    assert bool(jnp.all(jnp.isfinite(out)))
    print("KERNEL_OK")
</pallas_src>

<mosaic_0001>
module attributes {stable_mosaic.version = 11 : i64} {
  func.func @attention_aggregate_kernel(%arg0: memref<2x8x256xf32, #tpu.memory_space<vmem>>, %arg1: memref<8x16xbf16, #tpu.memory_space<vmem>>, %arg2: memref<1x16xf32, #tpu.memory_space<vmem>>, %arg3: memref<1x16xf32, #tpu.memory_space<vmem>>, %arg4: memref<16x20xbf16, #tpu.memory_space<vmem>>, %arg5: memref<1x20xf32, #tpu.memory_space<vmem>>, %arg6: memref<16x256xbf16, #tpu.memory_space<vmem>>, %arg7: memref<1x256xf32, #tpu.memory_space<vmem>>, %arg8: memref<20x4xf32, #tpu.memory_space<vmem>>, %arg9: memref<4x20xf32, #tpu.memory_space<vmem>>, %arg10: memref<20x640xbf16, #tpu.memory_space<vmem>>, %arg11: memref<2x640xf32, #tpu.memory_space<vmem>>, %arg12: memref<2x256xf32, #tpu.memory_space<vmem>>) attributes {dimension_semantics = [], scalar_prefetch = 0 : i64, scratch_operands = 0 : i64, tpu.core_type = #tpu.core_type<tc>} {
    %c0 = arith.constant 0 : index
    %c0_0 = arith.constant 0 : index
    %c0_1 = arith.constant 0 : index
    %0 = vector.load %arg0[%c0, %c0_0, %c0_1] : memref<2x8x256xf32, #tpu.memory_space<vmem>>, vector<2x8x256xf32>
    %cst = arith.constant dense<0.000000e+00> : vector<2x8xf32>
    %1 = vector.multi_reduction <add>, %0, %cst [2] : vector<2x8x256xf32> to vector<2x8xf32>
    %cst_2 = arith.constant 2.560000e+02 : f32
    %2 = vector.broadcast %cst_2 : f32 to vector<2x8xf32>
    %3 = arith.divf %1, %2 : vector<2x8xf32>
    %4 = arith.truncf %3 : vector<2x8xf32> to vector<2x8xbf16>
    %c0_3 = arith.constant 0 : index
    %c0_4 = arith.constant 0 : index
    %5 = vector.load %arg1[%c0_3, %c0_4] : memref<8x16xbf16, #tpu.memory_space<vmem>>, vector<8x16xbf16>
    %cst_5 = arith.constant dense<0.000000e+00> : vector<2x16xf32>
    %6 = tpu.matmul %4, %5, %cst_5 {dimension_numbers = #tpu.dot_dimension_numbers<[1], [0], [0], [1], [0, 0, 1, 1], [], []>} : vector<2x8xbf16>, vector<8x16xbf16>, vector<2x16xf32> -> vector<2x16xf32>
    %c0_6 = arith.constant 0 : index
    %c0_7 = arith.constant 0 : index
    %7 = vector.load %arg2[%c0_6, %c0_7] : memref<1x16xf32, #tpu.memory_space<vmem>>, vector<1x16xf32>
    %8 = vector.broadcast %7 : vector<1x16xf32> to vector<2x16xf32>
    %9 = arith.mulf %6, %8 : vector<2x16xf32>
    %c0_8 = arith.constant 0 : index
    %c0_9 = arith.constant 0 : index
    %10 = vector.load %arg3[%c0_8, %c0_9] : memref<1x16xf32, #tpu.memory_space<vmem>>, vector<1x16xf32>
    %11 = vector.broadcast %10 : vector<1x16xf32> to vector<2x16xf32>
    %12 = arith.addf %9, %11 : vector<2x16xf32>
    %cst_10 = arith.constant 0.000000e+00 : f32
    %13 = vector.broadcast %cst_10 : f32 to vector<2x16xf32>
    %14 = arith.maximumf %12, %13 : vector<2x16xf32>
    %15 = arith.truncf %14 : vector<2x16xf32> to vector<2x16xbf16>
    %c0_11 = arith.constant 0 : index
    %c0_12 = arith.constant 0 : index
    %16 = vector.load %arg6[%c0_11, %c0_12] : memref<16x256xbf16, #tpu.memory_space<vmem>>, vector<16x256xbf16>
    %cst_13 = arith.constant dense<0.000000e+00> : vector<2x256xf32>
    %17 = tpu.matmul %15, %16, %cst_13 {dimension_numbers = #tpu.dot_dimension_numbers<[1], [0], [0], [1], [0, 0, 1, 1], [], []>} : vector<2x16xbf16>, vector<16x256xbf16>, vector<2x256xf32> -> vector<2x256xf32>
    %c0_14 = arith.constant 0 : index
    %c0_15 = arith.constant 0 : index
    %18 = vector.load %arg7[%c0_14, %c0_15] : memref<1x256xf32, #tpu.memory_space<vmem>>, vector<1x256xf32>
    %19 = vector.broadcast %18 : vector<1x256xf32> to vector<2x256xf32>
    %20 = arith.addf %17, %19 : vector<2x256xf32>
    %c0_16 = arith.constant 0 : index
    %c0_17 = arith.constant 0 : index
    %21 = vector.load %arg12[%c0_16, %c0_17] : memref<2x256xf32, #tpu.memory_space<vmem>>, vector<2x256xf32>
    tpu.vector_store %arg12[%c0_16, %c0_17], %20 {strides = array<i32>} : memref<2x256xf32, #tpu.memory_space<vmem>>, vector<2x256xf32>,
    %c0_18 = arith.constant 0 : index
    %c0_19 = arith.constant 0 : index
    %22 = vector.load %arg4[%c0_18, %c0_19] : memref<16x20xbf16, #tpu.memory_space<vmem>>, vector<16x20xbf16>
    %cst_20 = arith.constant dense<0.000000e+00> : vector<2x20xf32>
    %23 = tpu.matmul %15, %22, %cst_20 {dimension_numbers = #tpu.dot_dimension_numbers<[1], [0], [0], [1], [0, 0, 1, 1], [], []>} : vector<2x16xbf16>, vector<16x20xbf16>, vector<2x20xf32> -> vector<2x20xf32>
    %c0_21 = arith.constant 0 : index
    %c0_22 = arith.constant 0 : index
    %24 = vector.load %arg5[%c0_21, %c0_22] : memref<1x20xf32, #tpu.memory_space<vmem>>, vector<1x20xf32>
    %25 = vector.broadcast %24 : vector<1x20xf32> to vector<2x20xf32>
    %26 = arith.addf %23, %25 : vector<2x20xf32>
    %27 = math.absf %26 : vector<2x20xf32>
    %c0_23 = arith.constant 0 : index
    %c0_24 = arith.constant 0 : index
    %28 = vector.load %arg8[%c0_23, %c0_24] : memref<20x4xf32, #tpu.memory_space<vmem>>, vector<20x4xf32>
    %cst_25 = arith.constant dense<0.000000e+00> : vector<2x4xf32>
    %29 = tpu.matmul %27, %28, %cst_25 {dimension_numbers = #tpu.dot_dimension_numbers<[1], [0], [0], [1], [0, 0, 1, 1], [], []>} : vector<2x20xf32>, vector<20x4xf32>, vector<2x4xf32> -> vector<2x4xf32>
    %cst_26 = arith.constant 1.000000e-03 : f32
    %30 = vector.broadcast %cst_26 : f32 to vector<2x4xf32>
    %31 = arith.addf %29, %30 : vector<2x4xf32>
    %32 = tpu.reciprocal %31 {approx = true} : vector<2x4xf32> -> vector<2x4xf32>
    %c0_27 = arith.constant 0 : index
    %c0_28 = arith.constant 0 : index
    %33 = vector.load %arg9[%c0_27, %c0_28] : memref<4x20xf32, #tpu.memory_space<vmem>>, vector<4x20xf32>
    %cst_29 = arith.constant dense<0.000000e+00> : vector<2x20xf32>
    %34 = tpu.matmul %32, %33, %cst_29 {dimension_numbers = #tpu.dot_dimension_numbers<[1], [0], [0], [1], [0, 0, 1, 1], [], []>} : vector<2x4xf32>, vector<4x20xf32>, vector<2x20xf32> -> vector<2x20xf32>
    %35 = arith.mulf %26, %34 : vector<2x20xf32>
    %36 = arith.truncf %35 : vector<2x20xf32> to vector<2x20xbf16>
    %c0_30 = arith.constant 0 : index
    %c0_31 = arith.constant 0 : index
    %37 = vector.load %arg10[%c0_30, %c0_31] : memref<20x640xbf16, #tpu.memory_space<vmem>>, vector<20x640xbf16>
    %cst_32 = arith.constant dense<0.000000e+00> : vector<2x640xf32>
    %38 = tpu.matmul %36, %37, %cst_32 {dimension_numbers = #tpu.dot_dimension_numbers<[1], [0], [0], [1], [0, 0, 1, 1], [], []>} : vector<2x20xbf16>, vector<20x640xbf16>, vector<2x640xf32> -> vector<2x640xf32>
    %c0_33 = arith.constant 0 : index
    %c0_34 = arith.constant 0 : index
    %39 = vector.load %arg11[%c0_33, %c0_34] : memref<2x640xf32, #tpu.memory_space<vmem>>, vector<2x640xf32>
    tpu.vector_store %arg11[%c0_33, %c0_34], %38 {strides = array<i32>} : memref<2x640xf32, #tpu.memory_space<vmem>>, vector<2x640xf32>,
    return
  }
}

module attributes {stable_mosaic.version = 11 : i64} {
  func.func @conv_bn_kernel_batched(%arg0: memref<2x8x81xbf16, #tpu.memory_space<vmem>>, %arg1: memref<2x81x256xbf16, #tpu.memory_space<vmem>>, %arg2: memref<2x8x256xf32, #tpu.memory_space<vmem>>) attributes {dimension_semantics = [], scalar_prefetch = 0 : i64, scratch_operands = 0 : i64, tpu.core_type = #tpu.core_type<tc>} {
    %c0 = arith.constant 0 : index
    %c0_0 = arith.constant 0 : index
    %c0_1 = arith.constant 0 : index
    %0 = vector.load %arg0[%c0, %c0_0, %c0_1] : memref<2x8x81xbf16, #tpu.memory_space<vmem>>, vector<1x8x81xbf16>
    %1 = vector.shape_cast %0 : vector<1x8x81xbf16> to vector<8x81xbf16>
    %c0_2 = arith.constant 0 : index
    %c0_3 = arith.constant 0 : index
    %c0_4 = arith.constant 0 : index
    %2 = vector.load %arg1[%c0_2, %c0_3, %c0_4] : memref<2x81x256xbf16, #tpu.memory_space<vmem>>, vector<1x81x256xbf16>
    %3 = vector.shape_cast %2 : vector<1x81x256xbf16> to vector<81x256xbf16>
    %cst = arith.constant dense<0.000000e+00> : vector<8x256xf32>
    %4 = tpu.matmul %1, %3, %cst {dimension_numbers = #tpu.dot_dimension_numbers<[1], [0], [0], [1], [0, 0, 1, 1], [], []>} : vector<8x81xbf16>, vector<81x256xbf16>, vector<8x256xf32> -> vector<8x256xf32>
    %c0_5 = arith.constant 0 : index
    %c0_6 = arith.constant 0 : index
    %c0_7 = arith.constant 0 : index
    %5 = vector.load %arg2[%c0_5, %c0_6, %c0_7] : memref<2x8x256xf32, #tpu.memory_space<vmem>>, vector<1x8x256xf32>
    %6 = vector.shape_cast %5 : vector<1x8x256xf32> to vector<8x256xf32>
    %7 = vector.shape_cast %4 : vector<8x256xf32> to vector<1x8x256xf32>
    tpu.vector_store %arg2[%c0_5, %c0_6, %c0_7], %7 {strides = array<i32>} : memref<2x8x256xf32, #tpu.memory_space<vmem>>, vector<1x8x256xf32>,
    %c1 = arith.constant 1 : index
    %c0_8 = arith.constant 0 : index
    %c0_9 = arith.constant 0 : index
    %8 = vector.load %arg0[%c1, %c0_8, %c0_9] : memref<2x8x81xbf16, #tpu.memory_space<vmem>>, vector<1x8x81xbf16>
    %9 = vector.shape_cast %8 : vector<1x8x81xbf16> to vector<8x81xbf16>
    %c1_10 = arith.constant 1 : index
    %c0_11 = arith.constant 0 : index
    %c0_12 = arith.constant 0 : index
    %10 = vector.load %arg1[%c1_10, %c0_11, %c0_12] : memref<2x81x256xbf16, #tpu.memory_space<vmem>>, vector<1x81x256xbf16>
    %11 = vector.shape_cast %10 : vector<1x81x256xbf16> to vector<81x256xbf16>
    %cst_13 = arith.constant dense<0.000000e+00> : vector<8x256xf32>
    %12 = tpu.matmul %9, %11, %cst_13 {dimension_numbers = #tpu.dot_dimension_numbers<[1], [0], [0], [1], [0, 0, 1, 1], [], []>} : vector<8x81xbf16>, vector<81x256xbf16>, vector<8x256xf32> -> vector<8x256xf32>
    %c1_14 = arith.constant 1 : index
    %c0_15 = arith.constant 0 : index
    %c0_16 = arith.constant 0 : index
    %13 = vector.load %arg2[%c1_14, %c0_15, %c0_16] : memref<2x8x256xf32, #tpu.memory_space<vmem>>, vector<1x8x256xf32>
    %14 = vector.shape_cast %13 : vector<1x8x256xf32> to vector<8x256xf32>
    %15 = vector.shape_cast %12 : vector<8x256xf32> to vector<1x8x256xf32>
    tpu.vector_store %arg2[%c1_14, %c0_15, %c0_16], %15 {strides = array<i32>} : memref<2x8x256xf32, #tpu.memory_space<vmem>>, vector<1x8x256xf32>,
    return
  }
}

</mosaic_0001>

<bundles_post_ra>
// kernel: kwconv2d_forward.2
= control target key start
LH: loop header
LB: loop body
LE: loop exit
PB: predicated region body
PF: predicated region fallthrough
CT: control target
= control target key end

     0   :  { %v463_v6 = vmov 256.0   ;;  %vm78_vm0 = vcmask 1043456   ;;  %v67_v17 = vlaneseq  ;;  %vm71_vm2 = vcmask 1041409   ;;  %s652_s0 = inlined_call_operand.vmem [shape: f32[2,8,256], index: 0, kind: input, shape index: {}]   ;;  %s653_s2 = inlined_call_operand.vmem [shape: f32[1,16], index: 2, kind: input, shape index: {}]   ;;  %s654_s3 = inlined_call_operand.vmem [shape: f32[1,16], index: 3, kind: input, shape index: {}]   ;;  %s655_s1 = inlined_call_operand.vmem [shape: bf16[8,16], index: 1, kind: input, shape index: {}]   ;;  %s656_s6 = inlined_call_operand.vmem [shape: bf16[16,256], index: 6, kind: input, shape index: {}]   ;;  %s657_s4 = inlined_call_operand.vmem [shape: bf16[16,20], index: 4, kind: input, shape index: {}]   ;;  %s658_s8 = inlined_call_operand.vmem [shape: f32[20,4], index: 8, kind: input, shape index: {}]   ;;  %s659_s5 = inlined_call_operand.vmem [shape: f32[1,20], index: 5, kind: input, shape index: {}]   ;;  %s660_s9 = inlined_call_operand.vmem [shape: f32[4,20], index: 9, kind: input, shape index: {}]   ;;  %s661_s7 = inlined_call_operand.vmem [shape: f32[1,256], index: 7, kind: input, shape index: {}]   ;;  %s662_s12 = inlined_call_operand.vmem [shape: f32[2,256], index: 12, kind: output, shape index: {1}]   ;;  %s663_s10 = inlined_call_operand.vmem [shape: bf16[20,640], index: 10, kind: input, shape index: {}]   ;;  %s664_s11 = inlined_call_operand.vmem [shape: f32[2,640], index: 11, kind: output, shape index: {0}]  }
   0x1   :  { %v41_v0 = vld [vmem:[%s652_s0] sm:$0xff]  ;;  %v42_v1 = vld [vmem:[%s652_s0 + $0x8] sm:$0xff]  ;;  %v43_v3 = vld [vmem:[%s652_s0 + $0x10] sm:$0xff]  ;;  %459 = vrcp.f32 %v463_v6  ;;  %vm74_vm3 = vcmask 64512   ;;  %vm125_vm4 = vcmask 130048   ;;  %vm158_vm5 = vcmask 1041408  }
   0x2   :  { %v45_v2 = vadd.f32 %v42_v1, %v41_v0  ;;  %v44_v4 = vld [vmem:[%s652_s0 + $0x18] sm:$0xff]  ;;  %v62_v8 = vld [vmem:[%s655_s1] sm:$0xf]  ;;  %v68_v21 = vand.u32 127, %v67_v17  ;;  %v448_v30 = vld [vmem:[%s656_s6 + $0x4] sm:$0xf0] }
   0x3   :  { %v48_v5 = vadd.f32 %v44_v4, %v43_v3  ;;  %v80_v10 = vsel %vm78_vm0, %v62_v8, 0  ;;  %v405_v29 = vld [vmem:[%s656_s6] sm:$0xf]  ;;  %v447_v31 = vld [vmem:[%s656_s6 + $0x4] sm:$0xf]  ;;  %v189_v45 = vld [vmem:[%s658_s8 + $0x8] sm:$0xff] }
   0x4   :  { %46 = vadd.xlane.f32.xlu0 %v45_v2  ;;  %89 = vmatpush.bf16.msra.mxu0 %v80_v10  ;;  %v406_v32 = vor.u32 %v448_v30, %v405_v29  ;;  %v407_v33 = vld [vmem:[%s656_s6 + $0x8] sm:$0xf0]  ;;  %v449_v34 = vld [vmem:[%s657_s4] sm:$0xff]  ;;  %v190_v36 = vld [vmem:[%s658_s8 + $0x10] sm:$0xf]  ;;  %vm191_vm6 = vcmask 162816  }
   0x5   :  { %v410_v35 = vor.u32 %v447_v31, %v407_v33  ;;  %181 = vmatpush.bf16.msra.mxu3 %v449_v34  ;;  %v456_v37 = vld [vmem:[%s653_s2] ss:$0 sm:$0xff]  ;;  %v255_v0 = vld [vmem:[%s663_s10 + $0x28] sm:$0x33]  ;;  %v256_v3 = vld [vmem:[%s663_s10 + $0x30] sm:$0x33] }
   0x6   :  { %136 = vmatpush.bf16.msra.mxu1 %v406_v32  ;;  %v457_v38 = vld [vmem:[%s654_s3] ss:$0 sm:$0xff]  ;;  %v277_v1 = vunpack.c.l.b16 %v255_v0  ;;  %v278_v2 = vunpack.c.h.b16 %v255_v0  ;;  %v279_v4 = vunpack.c.l.b16 %v256_v3  ;;  %v452_v8 = vld [vmem:[%s663_s10 + $0x10] sm:$0xf0]  ;;  %vm220_vm7 = vcmask 31744  }
   0x7   :  { %v460_v7 = vpop.eup %459  ;;  %149 = vmatpush.bf16.msra.mxu2 %v410_v35  ;;  %v188_v46 = vld [vmem:[%s658_s8] sm:$0xff]  ;;  %v257_v29 = vld [vmem:[%s663_s10 + $0x38] sm:$0x3]  ;;  %v440_v32 = vld [vmem:[%s663_s10 + $0x10] sm:$0xf]  ;;  %vm388_vm8 = vcmask 1045508  }
   0x8   :  { %v52_v9 = vmul.f32 256.0, %v460_v7  ;;  %vm56_vm1 = vweird.f32 %v460_v7  ;;  %418 = vmatpush.msk.msrb.mxu0 %vm78_vm0, %v190_v36  ;;  %v219_v47 = vld [vmem:[%s660_s9] sm:$0xf]  ;;  %v287_v6 = vpack.c.b16 %v277_v1, %v277_v1  ;;  %v289_v10 = vpack.c.b16 %v279_v4, %v279_v4  ;;  %v454_v33 = vld [vmem:[%s663_s10 + $0x20] sm:$0xf0] }
   0x9   :  { %v109_v49 = vld [vmem:[%s661_s7] sm:$0x3]  ;;  %v281_v30 = vunpack.c.l.b16 %v257_v29  ;;  %v441_v35 = vor.u32 %v454_v33, %v440_v32 }
   0xa   :  { %v53_v11 = vsub.f32 1.0, %v52_v9  ;;  %212 = vmatpush.msrb.mxu0 %v189_v45  ;;  %420 = vmatpush.msk.msrb.mxu1 %vm78_vm0, %v219_v47  ;;  %v112_v50 = vperm.slane %v109_v49, 1  ;;  %v458_v51 = vld [vmem:[%s659_s5] ss:$0 sm:$0xff]  ;;  %v111_v52 = vperm.slane %v109_v49, 0  ;;  %v288_v9 = vpack.c.b16 %v278_v2, %v278_v2 }
   0xb   :  { %v291_v31 = vpack.c.b16 %v281_v30, %v281_v30 }
   0xc   :  { %49 = vadd.xlane.f32.xlu0 %v48_v5  ;;  %v54_v12 = vmul.f32 %v460_v7, %v53_v11  ;;  %213 = vmatpush.msrb.mxu0 %v188_v46  ;;  %v280_v5 = vunpack.c.h.b16 %v256_v3 }
   0xd   :  { %v313_v34 = vsel %vm158_vm5, %v291_v31, 0 }
   0xe   :  { %v55_v13 = vadd.f32 %v460_v7, %v54_v12  ;;  %v290_v11 = vpack.c.b16 %v280_v5, %v280_v5  ;;  %v301_v12 = vsel %vm158_vm5, %v287_v6, 0 }
   0xf   :  { %321 = vmatpush.bf16.msrb.mxu2 %v301_v12 }
  0x10   :  { %v57_v14 = vsel %vm56_vm1, %v460_v7, %v55_v13  ;;  %v424_v7 = vld [vmem:[%s663_s10] sm:$0xf]  ;;  %v304_v13 = vsel %vm158_vm5, %v288_v9, 0 }
  0x11   :  { %334 = vmatpush.bf16.msrb.mxu3 %v304_v13 }
  0x77   :  { %v47_v15 = vpop.xlane.xlu0 %46 }
  0x78   :  { %v58_v16 = vmul.f32 %v57_v14, %v47_v15  ;;  %v307_v15 = vsel %vm158_vm5, %v289_v10, 0 }
  0x7a   :  { %v60_v18 = vpack.c.bf16 %v58_v16, %v58_v16  ;;  %v310_v16 = vsel %vm158_vm5, %v290_v11, 0 }
  0x7c   :  { %v65_v22 = vunpack.c.l.b16 %v60_v18 }
  0x7e   :  { %v69_v25 = vperm.slane %v65_v22, %v68_v21  ;;  %v432_v22 = vld [vmem:[%s663_s10 + $0x8] sm:$0xf] }
  0x7f   :  { %v50_v19 = vpop.xlane.xlu0 %49 }
  0x80   :  { %v59_v20 = vmul.f32 %v57_v14, %v50_v19  ;;  %v425_v14 = vor.u32 %v452_v8, %v424_v7 }
  0x82   :  { %v61_v23 = vpack.c.bf16 %v59_v20, %v59_v20  ;;  %322 = vmatpush.bf16.msrb.mxu2 %v425_v14  ;;  %v450_v20 = vld [vmem:[%s663_s10 + $0x4] sm:$0xf] }
  0x84   :  { %v66_v24 = vunpack.c.l.b16 %v61_v23 }
  0x86   :  { %v70_v26 = vperm.slane %v66_v24, %v68_v21  ;;  %v426_v21 = vld [vmem:[%s663_s10 + $0x14] sm:$0xf0]  ;;  %v453_v24 = vld [vmem:[%s663_s10 + $0x18] sm:$0xf0] }
  0x87   :  { %v429_v23 = vor.u32 %v450_v20, %v426_v21 }
  0x88   :  { %v72_v27 = vsel %vm71_vm2, %v70_v26, %v69_v25  ;;  %v451_v25 = vld [vmem:[%s663_s10 + $0xc] sm:$0xf]  ;;  %v434_v26 = vld [vmem:[%s663_s10 + $0x1c] sm:$0xf0] }
  0x89   :  { %v73_v28 = vpack.c.b16 %v72_v27, %v72_v27  ;;  %v433_v27 = vor.u32 %v453_v24, %v432_v22  ;;  %335 = vmatpush.bf16.msrb.mxu3 %v429_v23 }
  0x8b   :  { %402 = vmatmul.msk.bf16.vlgmr.msra.gmra.mxu0 %vm74_vm3, %v73_v28  ;;  %v437_v28 = vor.u32 %v451_v25, %v434_v26 }
  0x8c   :  { %347 = vmatpush.bf16.msra.mxu0 %v307_v15 }
  0x90   :  { %348 = vmatpush.bf16.msra.mxu0 %v433_v27 }
 0x108   :  { %v91_v39 = vpop.f32.mrf.mxu0 }
 0x109   :  { %v99_v40 = vmul.f32 %v456_v37, %v91_v39 }
 0x10b   :  { %v104_v41 = vadd.f32 %v457_v38, %v99_v40 }
 0x10d   :  { %v105_v42 = vmax.f32 %v104_v41, 0.0 }
 0x10f   :  { %v106_v43 = vpack.c.bf16 %v105_v42, %v105_v42 }
 0x110   :  { %v93_v44 = vpop.f32.mrf.mxu0 }
 0x111   :  { %411 = vmatmul.msk.bf16.vlgmr.msra.gmra.mxu1 %vm125_vm4, %v106_v43  ;;  %412 = vmatmul.msk.bf16.vlgmr.msra.gmra.mxu2 %vm125_vm4, %v106_v43 }
 0x112   :  { %417 = vmatmul.msk.bf16.vlgmr.msra.gmra.mxu3 %vm125_vm4, %v106_v43  ;;  %360 = vmatpush.bf16.msra.mxu1 %v310_v16 }
 0x113   :  { %373 = vmatpush.bf16.msra.mxu2 %v313_v34 }
 0x116   :  { %361 = vmatpush.bf16.msra.mxu1 %v437_v28 }
 0x117   :  { %374 = vmatpush.bf16.msra.mxu2 %v441_v35 }
 0x18e   :  { %v138_v48 = vpop.f32.mrf.mxu1 }
 0x18f   :  { %v139_v58 = vadd.f32 %v138_v48, %v111_v52 }
 0x194   :  { %v151_v53 = vpop.f32.mrf.mxu2 }
 0x195   :  { %v152_v54 = vadd.f32 %v151_v53, %v112_v50  ;;  %v183_v55 = vpop.f32.mrf.mxu3 }
 0x196   :  { %v586_v56 = vadd.f32 %v458_v51, %v183_v55  ;;  %v140_v57 = vpop.f32.mrf.mxu1 }
 0x197   :  { %v157_v59 = vrot.slane %v152_v54, 6 }
 0x198   :  { %v187_v60 = vand.u32 2147483647, %v586_v56 }
 0x199   :  { %v159_v61 = vsel %vm158_vm5, %v139_v58, %v157_v59 }
 0x19a   :  { %161 = vst [vmem:[%s662_s12] sm:$0xf] %v159_v61  ;;  %419 = vmatmul.msk.f32.vlgmr.msrb.gmra.mxu0 %vm191_vm6, %v187_v60 }
 0x19c   :  { %v153_v62 = vpop.f32.mrf.mxu2 }
 0x19d   :  { %v185_v63 = vpop.f32.mrf.mxu3 }
 0x217   :  { %v215_v17 = vpop.f32.mrf.mxu0 }
 0x218   :  { %v216_v18 = vadd.f32 0.001, %v215_v17 }
 0x21a   :  { %461 = vrcp.f32 %v216_v18 }
 0x220   :  { %v462_v19 = vpop.eup %461 }
 0x221   :  { %421 = vmatmul.msk.f32.vlgmr.msrb.gmra.mxu1 %vm220_vm7, %v462_v19 }
 0x29e   :  { %v244_v36 = vpop.f32.mrf.mxu1 }
 0x29f   :  { %v247_v37 = vmul.f32 %v244_v36, %v586_v56 }
 0x2a1   :  { %v248_v38 = vpack.c.bf16 %v247_v37, %v247_v37 }
 0x2a3   :  { %442 = vmatmul.msk.bf16.vlgmr.msrb.gmra.mxu2 %vm191_vm6, %v248_v38  ;;  %443 = vmatmul.msk.bf16.vlgmr.msrb.gmra.mxu3 %vm191_vm6, %v248_v38 }
 0x2a4   :  { %444 = vmatmul.msk.bf16.vlgmr.msra.gmra.mxu0 %vm191_vm6, %v248_v38  ;;  %445 = vmatmul.msk.bf16.vlgmr.msra.gmra.mxu1 %vm191_vm6, %v248_v38 }
 0x2b3   :  { %446 = vmatmul.msk.bf16.vlgmr.msra.gmra.mxu2 %vm191_vm6, %v248_v38 }
 0x321   :  { %v350_v39 = vpop.f32.mrf.mxu0  ;;  %v363_v40 = vpop.f32.mrf.mxu1 }
 0x322   :  { %v385_v41 = vrot.slane %v350_v39, 4  ;;  %v386_v42 = vrot.slane %v363_v40, 2 }
 0x324   :  { %v389_v46 = vsel %vm388_vm8, %v385_v41, %v386_v42 }
 0x326   :  { %v324_v43 = vpop.f32.mrf.mxu2  ;;  %v337_v44 = vpop.f32.mrf.mxu3 }
 0x327   :  { %v384_v45 = vrot.slane %v337_v44, 6 }
 0x329   :  { %v387_v47 = vsel %vm158_vm5, %v324_v43, %v384_v45  ;;  %v352_v48 = vpop.f32.mrf.mxu0  ;;  %v365_v49 = vpop.f32.mrf.mxu1 }
 0x32a   :  { %v390_v50 = vsel %vm78_vm0, %v387_v47, %v389_v46 }
 0x32b   :  { %392 = vst [vmem:[%s664_s11] sm:$0xff] %v390_v50 }
 0x32e   :  { %v326_v51 = vpop.f32.mrf.mxu2  ;;  %v339_v52 = vpop.f32.mrf.mxu3 }
 0x336   :  { %v376_v53 = vpop.f32.mrf.mxu2 }
 0x337   :  { %393 = vst [vmem:[%s664_s11 + $0x8] sm:$0x3] %v376_v53 }
 0x33e   :  { %v378_v54 = vpop.f32.mrf.mxu2 }

// kernel: reverse.0
= control target key start
LH: loop header
LB: loop body
LE: loop exit
PB: predicated region body
PF: predicated region fallthrough
CT: control target
= control target key end

     0   :  { %v104_v10 = vlaneseq  ;;  %v97_v14 = vld [vmem:[#allocation0 + $0x7] ss:$-1 sm:$0xff]  ;;  %v111_v19 = vld [vmem:[#allocation0 + $0x17] ss:$-1 sm:$0xff]  ;;  %s606_s0 = inlined_call_operand.vmem [shape: f32[2,8,16,7], index: 0, kind: input, shape index: {}]   ;;  %s607_s1 = inlined_call_operand.vmem [shape: f32[2,8,16,7], index: 1, kind: output, shape index: {}]  }
   0x1   :  { %v61_v0 = vld [vmem:[%s606_s0] sm:$0xff]  ;;  %v63_v1 = vld [vmem:[%s606_s0 + $0x8] sm:$0xff]  ;;  %v65_v2 = vld [vmem:[%s606_s0 + $0x10] sm:$0xff]  ;;  %v98_v21 = vrot.slane %v97_v14, 1  ;;  %v112_v25 = vrot.slane %v111_v19, 1 }
   0x2   :  { %62 = vst [vmem:[#allocation0 + $0x8] sm:$0xff] %v61_v0  ;;  %v67_v3 = vld [vmem:[%s606_s0 + $0x18] sm:$0xff]  ;;  %v69_v4 = vld [vmem:[%s606_s0 + $0x20] sm:$0xff]  ;;  %v71_v5 = vld [vmem:[%s606_s0 + $0x28] sm:$0xff]  ;;  %v517_v17 = vshrl.u32 %v104_v10, 7 }
   0x3   :  { %64 = vst [vmem:[#allocation0 + $0x18] sm:$0xff] %v63_v1  ;;  %v73_v6 = vld [vmem:[%s606_s0 + $0x30] sm:$0xff]  ;;  %v75_v7 = vld [vmem:[%s606_s0 + $0x38] sm:$0xff]  ;;  %v77_v8 = vld [vmem:[%s606_s0 + $0x40] sm:$0xff] }
   0x4   :  { %66 = vst [vmem:[#allocation0 + $0x28] sm:$0xff] %v65_v2  ;;  %v79_v9 = vld [vmem:[%s606_s0 + $0x48] sm:$0xff]  ;;  %v81_v11 = vld [vmem:[%s606_s0 + $0x50] sm:$0xff]  ;;  %v83_v12 = vld [vmem:[%s606_s0 + $0x58] sm:$0xff]  ;;  %vm106_vm0 = vcmp.lt.s32.totalorder %v517_v17, 7 }
   0x5   :  { %68 = vst [vmem:[#allocation0 + $0x38] sm:$0xff] %v67_v3  ;;  %v85_v13 = vld [vmem:[%s606_s0 + $0x60] sm:$0xff]  ;;  %v87_v15 = vld [vmem:[%s606_s0 + $0x68] sm:$0xff]  ;;  %v89_v18 = vld [vmem:[%s606_s0 + $0x70] sm:$0xff] }
   0x6   :  { %70 = vst [vmem:[#allocation0 + $0x48] sm:$0xff] %v69_v4  ;;  %v91_v20 = vld [vmem:[%s606_s0 + $0x78] sm:$0xff]  ;;  %v125_v24 = vld [vmem:[#allocation0 + $0x27] ss:$-1 sm:$0xff]  ;;  %v139_v28 = vld [vmem:[#allocation0 + $0x37] ss:$-1 sm:$0xff] }
   0x7   :  { %72 = vst [vmem:[#allocation0 + $0x58] sm:$0xff] %v71_v5  ;;  %v126_v29 = vrot.slane %v125_v24, 1  ;;  %v153_v32 = vld [vmem:[#allocation0 + $0x47] ss:$-1 sm:$0xff]  ;;  %v140_v33 = vrot.slane %v139_v28, 1 }
   0x8   :  { %74 = vst [vmem:[#allocation0 + $0x68] sm:$0xff] %v73_v6  ;;  %v167_v36 = vld [vmem:[#allocation0 + $0x57] ss:$-1 sm:$0xff]  ;;  %v154_v37 = vrot.slane %v153_v32, 1  ;;  %v181_v40 = vld [vmem:[#allocation0 + $0x67] ss:$-1 sm:$0xff] }
   0x9   :  { %76 = vst [vmem:[#allocation0 + $0x78] sm:$0xff] %v75_v7  ;;  %v102_v16 = vld [vmem:[#allocation0 + $0xf] ss:$-1 sm:$0xff]  ;;  %v168_v41 = vrot.slane %v167_v36, 1  ;;  %v195_v44 = vld [vmem:[#allocation0 + $0x77] ss:$-1 sm:$0xff] }
   0xa   :  { %78 = vst [vmem:[#allocation0 + $0x88] sm:$0xff] %v77_v8  ;;  %v116_v22 = vld [vmem:[#allocation0 + $0x1f] ss:$-1 sm:$0xff]  ;;  %v103_v23 = vrot.slane %v102_v16, 1  ;;  %v182_v45 = vrot.slane %v181_v40, 1  ;;  %v196_v49 = vrot.slane %v195_v44, 1 }
   0xb   :  { %80 = vst [vmem:[#allocation0 + $0x98] sm:$0xff] %v79_v9  ;;  %v130_v26 = vld [vmem:[#allocation0 + $0x2f] ss:$-1 sm:$0xff]  ;;  %v117_v27 = vrot.slane %v116_v22, 1  ;;  %v209_v48 = vld [vmem:[#allocation0 + $0x87] ss:$-1 sm:$0xff] }
   0xc   :  { %82 = vst [vmem:[#allocation0 + $0xa8] sm:$0xff] %v81_v11  ;;  %v144_v30 = vld [vmem:[#allocation0 + $0x3f] ss:$-1 sm:$0xff]  ;;  %v131_v31 = vrot.slane %v130_v26, 1  ;;  %v223_v52 = vld [vmem:[#allocation0 + $0x97] ss:$-1 sm:$0xff] }
   0xd   :  { %84 = vst [vmem:[#allocation0 + $0xb8] sm:$0xff] %v83_v12  ;;  %v158_v34 = vld [vmem:[#allocation0 + $0x4f] ss:$-1 sm:$0xff]  ;;  %v145_v35 = vrot.slane %v144_v30, 1  ;;  %v210_v53 = vrot.slane %v209_v48, 1  ;;  %v224_v57 = vrot.slane %v223_v52, 1 }
   0xe   :  { %86 = vst [vmem:[#allocation0 + $0xc8] sm:$0xff] %v85_v13  ;;  %v172_v38 = vld [vmem:[#allocation0 + $0x5f] ss:$-1 sm:$0xff]  ;;  %v159_v39 = vrot.slane %v158_v34, 1  ;;  %v237_v56 = vld [vmem:[#allocation0 + $0xa7] ss:$-1 sm:$0xff] }
   0xf   :  { %88 = vst [vmem:[#allocation0 + $0xd8] sm:$0xff] %v87_v15  ;;  %v186_v42 = vld [vmem:[#allocation0 + $0x6f] ss:$-1 sm:$0xff]  ;;  %v173_v43 = vrot.slane %v172_v38, 1  ;;  %v251_v60 = vld [vmem:[#allocation0 + $0xb7] ss:$-1 sm:$0xff] }
  0x10   :  { %90 = vst [vmem:[#allocation0 + $0xe8] sm:$0xff] %v89_v18  ;;  %v200_v46 = vld [vmem:[#allocation0 + $0x7f] ss:$-1 sm:$0xff]  ;;  %v187_v47 = vrot.slane %v186_v42, 1  ;;  %v238_v61 = vrot.slane %v237_v56, 1  ;;  %v252_v1 = vrot.slane %v251_v60, 1 }
  0x11   :  { %92 = vst [vmem:[#allocation0 + $0xf8] sm:$0xff] %v91_v20  ;;  %v214_v50 = vld [vmem:[#allocation0 + $0x8f] ss:$-1 sm:$0xff]  ;;  %v201_v51 = vrot.slane %v200_v46, 1  ;;  %v265_v0 = vld [vmem:[#allocation0 + $0xc7] ss:$-1 sm:$0xff] }
  0x12   :  { %99 = vst [vmem:[#allocation1] sm:$0xff] %v98_v21  ;;  %v228_v54 = vld [vmem:[#allocation0 + $0x9f] ss:$-1 sm:$0xff]  ;;  %v215_v55 = vrot.slane %v214_v50, 1  ;;  %v279_v4 = vld [vmem:[#allocation0 + $0xd7] ss:$-1 sm:$0xff] }
  0x13   :  { %107 = vst.msk [vmem:[#allocation1] sm:$0xff] %vm106_vm0, %v103_v23  ;;  %v242_v58 = vld [vmem:[#allocation0 + $0xaf] ss:$-1 sm:$0xff]  ;;  %v229_v59 = vrot.slane %v228_v54, 1  ;;  %v266_v5 = vrot.slane %v265_v0, 1  ;;  %v280_v9 = vrot.slane %v279_v4, 1 }
  0x14   :  { %113 = vst [vmem:[#allocation1 + $0x8] sm:$0xff] %v112_v25  ;;  %v256_v62 = vld [vmem:[#allocation0 + $0xbf] ss:$-1 sm:$0xff]  ;;  %v243_v63 = vrot.slane %v242_v58, 1  ;;  %v293_v8 = vld [vmem:[#allocation0 + $0xe7] ss:$-1 sm:$0xff] }
  0x15   :  { %121 = vst.msk [vmem:[#allocation1 + $0x8] sm:$0xff] %vm106_vm0, %v117_v27  ;;  %v270_v2 = vld [vmem:[#allocation0 + $0xcf] ss:$-1 sm:$0xff]  ;;  %v257_v3 = vrot.slane %v256_v62, 1  ;;  %v307_v12 = vld [vmem:[#allocation0 + $0xf7] ss:$-1 sm:$0xff] }
  0x16   :  { %127 = vst [vmem:[#allocation1 + $0x10] sm:$0xff] %v126_v29  ;;  %v284_v6 = vld [vmem:[#allocation0 + $0xdf] ss:$-1 sm:$0xff]  ;;  %v271_v7 = vrot.slane %v270_v2, 1  ;;  %v294_v13 = vrot.slane %v293_v8, 1  ;;  %v308_v16 = vrot.slane %v307_v12, 1 }
  0x17   :  { %135 = vst.msk [vmem:[#allocation1 + $0x10] sm:$0xff] %vm106_vm0, %v131_v31  ;;  %v298_v10 = vld [vmem:[#allocation0 + $0xef] ss:$-1 sm:$0xff]  ;;  %v285_v11 = vrot.slane %v284_v6, 1 }
  0x18   :  { %141 = vst [vmem:[#allocation1 + $0x18] sm:$0xff] %v140_v33  ;;  %v312_v14 = vld [vmem:[#allocation0 + $0xff] ss:$-1 sm:$0xff]  ;;  %v299_v15 = vrot.slane %v298_v10, 1 }
  0x19   :  { %149 = vst.msk [vmem:[#allocation1 + $0x18] sm:$0xff] %vm106_vm0, %v145_v35  ;;  %v313_v18 = vrot.slane %v312_v14, 1 }
  0x1a   :  { %155 = vst [vmem:[#allocation1 + $0x20] sm:$0xff] %v154_v37  ;;  %v376_v19 = vld [vmem:[#allocation1] sm:$0xff] }
  0x1b   :  { %163 = vst.msk [vmem:[#allocation1 + $0x20] sm:$0xff] %vm106_vm0, %v159_v39 }
  0x1c   :  { %169 = vst [vmem:[#allocation1 + $0x28] sm:$0xff] %v168_v41  ;;  %v378_v20 = vld [vmem:[#allocation1 + $0x8] sm:$0xff] }
  0x1d   :  { %177 = vst.msk [vmem:[#allocation1 + $0x28] sm:$0xff] %vm106_vm0, %v173_v43 }
  0x1e   :  { %183 = vst [vmem:[#allocation1 + $0x30] sm:$0xff] %v182_v45  ;;  %v380_v17 = vld [vmem:[#allocation1 + $0x10] sm:$0xff] }
  0x1f   :  { %191 = vst.msk [vmem:[#allocation1 + $0x30] sm:$0xff] %vm106_vm0, %v187_v47 }
  0x20   :  { %197 = vst [vmem:[#allocation1 + $0x38] sm:$0xff] %v196_v49  ;;  %v382_v21 = vld [vmem:[#allocation1 + $0x18] sm:$0xff] }
  0x21   :  { %205 = vst.msk [vmem:[#allocation1 + $0x38] sm:$0xff] %vm106_vm0, %v201_v51 }
  0x22   :  { %211 = vst [vmem:[#allocation1 + $0x40] sm:$0xff] %v210_v53  ;;  %v384_v22 = vld [vmem:[#allocation1 + $0x20] sm:$0xff] }
  0x23   :  { %219 = vst.msk [vmem:[#allocation1 + $0x40] sm:$0xff] %vm106_vm0, %v215_v55 }
  0x24   :  { %225 = vst [vmem:[#allocation1 + $0x48] sm:$0xff] %v224_v57  ;;  %v386_v23 = vld [vmem:[#allocation1 + $0x28] sm:$0xff] }
  0x25   :  { %233 = vst.msk [vmem:[#allocation1 + $0x48] sm:$0xff] %vm106_vm0, %v229_v59 }
  0x26   :  { %239 = vst [vmem:[#allocation1 + $0x50] sm:$0xff] %v238_v61  ;;  %v388_v24 = vld [vmem:[#allocation1 + $0x30] sm:$0xff] }
  0x27   :  { %247 = vst.msk [vmem:[#allocation1 + $0x50] sm:$0xff] %vm106_vm0, %v243_v63 }
  0x28   :  { %253 = vst [vmem:[#allocation1 + $0x58] sm:$0xff] %v252_v1  ;;  %v390_v25 = vld [vmem:[#allocation1 + $0x38] sm:$0xff] }
  0x29   :  { %261 = vst.msk [vmem:[#allocation1 + $0x58] sm:$0xff] %vm106_vm0, %v257_v3 }
  0x2a   :  { %267 = vst [vmem:[#allocation1 + $0x60] sm:$0xff] %v266_v5  ;;  %v392_v26 = vld [vmem:[#allocation1 + $0x40] sm:$0xff] }
  0x2b   :  { %275 = vst.msk [vmem:[#allocation1 + $0x60] sm:$0xff] %vm106_vm0, %v271_v7 }
  0x2c   :  { %281 = vst [vmem:[#allocation1 + $0x68] sm:$0xff] %v280_v9  ;;  %v394_v27 = vld [vmem:[#allocation1 + $0x48] sm:$0xff] }
  0x2d   :  { %289 = vst.msk [vmem:[#allocation1 + $0x68] sm:$0xff] %vm106_vm0, %v285_v11 }
  0x2e   :  { %295 = vst [vmem:[#allocation1 + $0x70] sm:$0xff] %v294_v13  ;;  %v396_v28 = vld [vmem:[#allocation1 + $0x50] sm:$0xff] }
  0x2f   :  { %303 = vst.msk [vmem:[#allocation1 + $0x70] sm:$0xff] %vm106_vm0, %v299_v15 }
  0x30   :  { %309 = vst [vmem:[#allocation1 + $0x78] sm:$0xff] %v308_v16  ;;  %v398_v29 = vld [vmem:[#allocation1 + $0x58] sm:$0xff] }
  0x31   :  { %317 = vst.msk [vmem:[#allocation1 + $0x78] sm:$0xff] %vm106_vm0, %v313_v18 }
  0x32   :  { %377 = vst [vmem:[%s607_s1] sm:$0xff] %v376_v19  ;;  %v400_v30 = vld [vmem:[#allocation1 + $0x60] sm:$0xff] }
  0x33   :  { %379 = vst [vmem:[%s607_s1 + $0x8] sm:$0xff] %v378_v20 }
  0x34   :  { %381 = vst [vmem:[%s607_s1 + $0x10] sm:$0xff] %v380_v17  ;;  %v402_v31 = vld [vmem:[#allocation1 + $0x68] sm:$0xff] }
  0x35   :  { %383 = vst [vmem:[%s607_s1 + $0x18] sm:$0xff] %v382_v21 }
  0x36   :  { %385 = vst [vmem:[%s607_s1 + $0x20] sm:$0xff] %v384_v22  ;;  %v404_v32 = vld [vmem:[#allocation1 + $0x70] sm:$0xff] }
  0x37   :  { %387 = vst [vmem:[%s607_s1 + $0x28] sm:$0xff] %v386_v23 }
  0x38   :  { %389 = vst [vmem:[%s607_s1 + $0x30] sm:$0xff] %v388_v24  ;;  %v406_v33 = vld [vmem:[#allocation1 + $0x78] sm:$0xff] }
  0x39   :  { %391 = vst [vmem:[%s607_s1 + $0x38] sm:$0xff] %v390_v25 }
  0x3a   :  { %393 = vst [vmem:[%s607_s1 + $0x40] sm:$0xff] %v392_v26 }
  0x3b   :  { %395 = vst [vmem:[%s607_s1 + $0x48] sm:$0xff] %v394_v27 }
  0x3c   :  { %397 = vst [vmem:[%s607_s1 + $0x50] sm:$0xff] %v396_v28 }
  0x3d   :  { %399 = vst [vmem:[%s607_s1 + $0x58] sm:$0xff] %v398_v29 }
  0x3e   :  { %401 = vst [vmem:[%s607_s1 + $0x60] sm:$0xff] %v400_v30 }
  0x3f   :  { %403 = vst [vmem:[%s607_s1 + $0x68] sm:$0xff] %v402_v31 }
  0x40   :  { %405 = vst [vmem:[%s607_s1 + $0x70] sm:$0xff] %v404_v32 }
  0x41   :  { %407 = vst [vmem:[%s607_s1 + $0x78] sm:$0xff] %v406_v33 }

// kernel: kwconv2d_forward.3
= control target key start
LH: loop header
LB: loop body
LE: loop exit
PB: predicated region body
PF: predicated region fallthrough
CT: control target
= control target key end

     0   :  { %vm83_vm0 = vcmask 1040384   ;;  %v350_v6 = vmov 0   ;;  %vm79_vm1 = vcmask 662528   ;;  %s510_s1 = inlined_call_operand.vmem [shape: bf16[2,81,256], index: 1, kind: input, shape index: {}]   ;;  %s511_s0 = inlined_call_operand.vmem [shape: bf16[2,8,81], index: 0, kind: input, shape index: {}]   ;;  %s512_s2 = inlined_call_operand.vmem [shape: f32[2,8,256], index: 2, kind: output, shape index: {}]  }
   0x1   :  { %v23_v0 = vld [vmem:[%s510_s1 + $0x50] sm:$0x11]  ;;  %v284_v1 = vld [vmem:[%s510_s1 + $0xa8] sm:$0x11]  ;;  %v85_v7 = vsel %vm83_vm0, 65535, %v350_v6 }
   0x2   :  { %v55_v2 = vunpack.c.l.b16 %v23_v0  ;;  %v56_v3 = vunpack.c.h.b16 %v23_v0  ;;  %v165_v4 = vunpack.c.l.b16 %v284_v1  ;;  %v166_v5 = vunpack.c.h.b16 %v284_v1  ;;  %v265_v12 = vld [vmem:[%s510_s1 + $0x40] sm:$0xf]  ;;  %v338_v13 = vld [vmem:[%s510_s1 + $0x44] sm:$0xf0]  ;;  %v337_v14 = vld [vmem:[%s510_s1 + $0x44] sm:$0xf] }
   0x3   :  { %v267_v15 = vld [vmem:[%s510_s1 + $0x48] sm:$0xf0]  ;;  %v319_v16 = vld [vmem:[%s510_s1 + $0x98] sm:$0xf]  ;;  %v348_v21 = vld [vmem:[%s510_s1 + $0x9c] sm:$0xf0]  ;;  %v266_v24 = vor.u32 %v338_v13, %v265_v12 }
   0x4   :  { %v67_v8 = vpack.c.b16 %v55_v2, %v55_v2  ;;  %v68_v9 = vpack.c.b16 %v56_v3, %v56_v3  ;;  %v177_v10 = vpack.c.b16 %v165_v4, %v165_v4  ;;  %v178_v11 = vpack.c.b16 %v166_v5, %v166_v5  ;;  %v347_v22 = vld [vmem:[%s510_s1 + $0x9c] sm:$0xf]  ;;  %v321_v23 = vld [vmem:[%s510_s1 + $0xa0] sm:$0xf0]  ;;  %v257_v26 = vld [vmem:[%s510_s1 + $0x30] sm:$0xf] }
   0x5   :  { %v270_v25 = vor.u32 %v337_v14, %v267_v15  ;;  %v336_v27 = vld [vmem:[%s510_s1 + $0x34] sm:$0xf0]  ;;  %v320_v28 = vor.u32 %v348_v21, %v319_v16  ;;  %v324_v29 = vor.u32 %v347_v22, %v321_v23  ;;  %v335_v30 = vld [vmem:[%s510_s1 + $0x34] sm:$0xf]  ;;  %v259_v31 = vld [vmem:[%s510_s1 + $0x38] sm:$0xf0] }
   0x6   :  { %v87_v17 = vand.u32 %v85_v7, %v67_v8  ;;  %v90_v18 = vand.u32 %v85_v7, %v68_v9  ;;  %v193_v19 = vand.u32 %v177_v10, %v85_v7  ;;  %v196_v20 = vand.u32 %v178_v11, %v85_v7  ;;  %v311_v32 = vld [vmem:[%s510_s1 + $0x88] sm:$0xf]  ;;  %v346_v33 = vld [vmem:[%s510_s1 + $0x8c] sm:$0xf0]  ;;  %v345_v34 = vld [vmem:[%s510_s1 + $0x8c] sm:$0xf] }
   0x7   :  { %v313_v35 = vld [vmem:[%s510_s1 + $0x90] sm:$0xf0]  ;;  %v258_v36 = vor.u32 %v336_v27, %v257_v26  ;;  %v262_v37 = vor.u32 %v335_v30, %v259_v31  ;;  %v249_v38 = vld [vmem:[%s510_s1 + $0x20] sm:$0xf]  ;;  %v334_v39 = vld [vmem:[%s510_s1 + $0x24] sm:$0xf0]  ;;  %v312_v40 = vor.u32 %v346_v33, %v311_v32 }
   0x8   :  { %94 = vmatpush.bf16.msra.mxu0 %v87_v17  ;;  %107 = vmatpush.bf16.msra.mxu1 %v90_v18  ;;  %v316_v41 = vor.u32 %v345_v34, %v313_v35  ;;  %v333_v42 = vld [vmem:[%s510_s1 + $0x24] sm:$0xf]  ;;  %v251_v43 = vld [vmem:[%s510_s1 + $0x28] sm:$0xf0]  ;;  %v303_v44 = vld [vmem:[%s510_s1 + $0x78] sm:$0xf]  ;;  %v250_v48 = vor.u32 %v334_v39, %v249_v38 }
   0x9   :  { %200 = vmatpush.bf16.msra.mxu2 %v193_v19  ;;  %213 = vmatpush.bf16.msra.mxu3 %v196_v20  ;;  %v344_v45 = vld [vmem:[%s510_s1 + $0x7c] sm:$0xf0]  ;;  %v343_v46 = vld [vmem:[%s510_s1 + $0x7c] sm:$0xf]  ;;  %v305_v47 = vld [vmem:[%s510_s1 + $0x80] sm:$0xf0]  ;;  %v254_v49 = vor.u32 %v333_v42, %v251_v43 }
   0xa   :  { %v241_v50 = vld [vmem:[%s510_s1 + $0x10] sm:$0xf]  ;;  %v332_v51 = vld [vmem:[%s510_s1 + $0x14] sm:$0xf0]  ;;  %v304_v52 = vor.u32 %v344_v45, %v303_v44  ;;  %v308_v53 = vor.u32 %v343_v46, %v305_v47  ;;  %v331_v54 = vld [vmem:[%s510_s1 + $0x14] sm:$0xf] }
   0xb   :  { %v243_v55 = vld [vmem:[%s510_s1 + $0x18] sm:$0xf0]  ;;  %v295_v56 = vld [vmem:[%s510_s1 + $0x68] sm:$0xf]  ;;  %v342_v57 = vld [vmem:[%s510_s1 + $0x6c] sm:$0xf0]  ;;  %v242_v60 = vor.u32 %v332_v51, %v241_v50 }
   0xc   :  { %95 = vmatpush.bf16.msra.mxu0 %v266_v24  ;;  %108 = vmatpush.bf16.msra.mxu1 %v270_v25  ;;  %v341_v58 = vld [vmem:[%s510_s1 + $0x6c] sm:$0xf]  ;;  %v297_v59 = vld [vmem:[%s510_s1 + $0x70] sm:$0xf0]  ;;  %v246_v61 = vor.u32 %v331_v54, %v243_v55  ;;  %v233_v62 = vld [vmem:[%s510_s1] sm:$0xf]  ;;  %v296_v0 = vor.u32 %v342_v57, %v295_v56 }
   0xd   :  { %201 = vmatpush.bf16.msra.mxu2 %v320_v28  ;;  %214 = vmatpush.bf16.msra.mxu3 %v324_v29  ;;  %v330_v63 = vld [vmem:[%s510_s1 + $0x4] sm:$0xf0]  ;;  %v300_v1 = vor.u32 %v341_v58, %v297_v59  ;;  %v329_v2 = vld [vmem:[%s510_s1 + $0x4] sm:$0xf]  ;;  %v235_v3 = vld [vmem:[%s510_s1 + $0x8] sm:$0xf0] }
   0xe   :  { %v287_v4 = vld [vmem:[%s510_s1 + $0x58] sm:$0xf]  ;;  %v340_v5 = vld [vmem:[%s510_s1 + $0x5c] sm:$0xf0]  ;;  %v339_v6 = vld [vmem:[%s510_s1 + $0x5c] sm:$0xf]  ;;  %v234_v8 = vor.u32 %v330_v63, %v233_v62  ;;  %v238_v9 = vor.u32 %v329_v2, %v235_v3 }
   0xf   :  { %v289_v7 = vld [vmem:[%s510_s1 + $0x60] sm:$0xf0]  ;;  %v288_v10 = vor.u32 %v340_v5, %v287_v4  ;;  %v12_v12 = vld [vmem:[%s511_s0] sm:$0xf] }
  0x10   :  { %96 = vmatpush.bf16.msra.mxu0 %v258_v36  ;;  %109 = vmatpush.bf16.msra.mxu1 %v262_v37  ;;  %v292_v11 = vor.u32 %v339_v6, %v289_v7  ;;  %v273_v13 = vld [vmem:[%s511_s0 + $0x4] sm:$0xf] }
  0x11   :  { %202 = vmatpush.bf16.msra.mxu2 %v312_v40  ;;  %215 = vmatpush.bf16.msra.mxu3 %v316_v41 }
  0x14   :  { %97 = vmatpush.bf16.msra.mxu0 %v250_v48  ;;  %110 = vmatpush.bf16.msra.mxu1 %v254_v49 }
  0x15   :  { %203 = vmatpush.bf16.msra.mxu2 %v304_v52  ;;  %216 = vmatpush.bf16.msra.mxu3 %v308_v53 }
  0x18   :  { %98 = vmatpush.bf16.msra.mxu0 %v242_v60  ;;  %111 = vmatpush.bf16.msra.mxu1 %v246_v61 }
  0x19   :  { %204 = vmatpush.bf16.msra.mxu2 %v296_v0  ;;  %217 = vmatpush.bf16.msra.mxu3 %v300_v1 }
  0x1c   :  { %99 = vmatpush.bf16.msra.mxu0 %v234_v8  ;;  %112 = vmatpush.bf16.msra.mxu1 %v238_v9 }
  0x1d   :  { %205 = vmatpush.bf16.msra.mxu2 %v288_v10  ;;  %218 = vmatpush.bf16.msra.mxu3 %v292_v11 }
  0x1f   :  { %271 = vmatmul.msk.bf16.vlgmr.msra.gmra.mxu0 %vm79_vm1, %v12_v12  ;;  %272 = vmatmul.msk.bf16.vlgmr.msra.gmra.mxu1 %vm79_vm1, %v12_v12 }
  0x20   :  { %325 = vmatmul.msk.bf16.vlgmr.msra.gmra.mxu2 %vm79_vm1, %v273_v13  ;;  %326 = vmatmul.msk.bf16.vlgmr.msra.gmra.mxu3 %vm79_vm1, %v273_v13 }
  0x9c   :  { %v101_v14 = vpop.f32.mrf.mxu0  ;;  %v114_v15 = vpop.f32.mrf.mxu1 }
  0x9d   :  { %118 = vst [vmem:[%s512_s2] sm:$0xff] %v101_v14 }
  0x9e   :  { %119 = vst [vmem:[%s512_s2 + $0x8] sm:$0xff] %v114_v15 }
  0xa3   :  { %v207_v16 = vpop.f32.mrf.mxu2  ;;  %v220_v17 = vpop.f32.mrf.mxu3 }
  0xa4   :  { %327 = vst [vmem:[%s512_s2 + $0x10] sm:$0xff] %v207_v16  ;;  %v103_v18 = vpop.f32.mrf.mxu0  ;;  %v116_v19 = vpop.f32.mrf.mxu1 }
  0xa5   :  { %328 = vst [vmem:[%s512_s2 + $0x18] sm:$0xff] %v220_v17 }
  0xab   :  { %v209_v20 = vpop.f32.mrf.mxu2  ;;  %v222_v21 = vpop.f32.mrf.mxu3 }

</bundles_post_ra>
